<compile_context>
chip_gen: v5e
topology: v5e:2x2
jax: 0.10.0
libtpu: 0.0.40
codegen_flags: <defaults>
</compile_context>

<pallas_src>
import functools

import jax
import jax.numpy as jnp
from jax.experimental import pallas as pl
from jax.experimental.pallas import tpu as pltpu


def _round_up(x: int, m: int) -> int:
    return ((x + m - 1) // m) * m


def _largest_aligned_divisor(total: int, align: int, cap: int) -> int:
    """Largest t with t % align == 0, t <= cap, total % t == 0 (total % align == 0)."""
    best = align
    t = align
    limit = min(cap, total)
    while t <= limit:
        if total % t == 0:
            best = t
        t += align
    return best


def _pick_tm(m_pad: int, cap: int) -> int:
    tm = _largest_aligned_divisor(m_pad, 8, cap)
    # Prefer >= 2 blocks along the parallel M axis (v7x has 2 TensorCores).
    if m_pad // tm == 1 and m_pad > 8:
        half = m_pad // 2
        if half % 8 == 0:
            tm = half
    return tm


# ---------------- kernels ----------------

def _resident_bias_kernel(x_ref, wt_ref, b_ref, o_ref):
    # x_ref: (TM, Kp)  wt_ref: (Kp, Np)  b_ref: (1, Np)  o_ref: (TM, Np) f32
    o_ref[...] = (
        jnp.dot(x_ref[...], wt_ref[...], preferred_element_type=jnp.float32)
        + b_ref[...]
    ).astype(o_ref.dtype)


def _resident_kernel(x_ref, wt_ref, o_ref):
    o_ref[...] = jnp.dot(
        x_ref[...], wt_ref[...], preferred_element_type=jnp.float32
    ).astype(o_ref.dtype)


def _tiled_bias_kernel(x_ref, wt_ref, b_ref, o_ref):
    # x_ref: (TM, TK)  wt_ref: (TK, TN)  b_ref: (1, TN)  o_ref: (TM, TN) f32, k-resident
    k = pl.program_id(2)

    @pl.when(k == 0)
    def _init():
        o_ref[...] = jnp.zeros_like(o_ref)

    o_ref[...] += jnp.dot(x_ref[...], wt_ref[...], preferred_element_type=jnp.float32)

    @pl.when(k == pl.num_programs(2) - 1)
    def _finalize():
        o_ref[...] += b_ref[...]


def _tiled_kernel(x_ref, wt_ref, o_ref):
    k = pl.program_id(2)

    @pl.when(k == 0)
    def _init():
        o_ref[...] = jnp.zeros_like(o_ref)

    o_ref[...] += jnp.dot(x_ref[...], wt_ref[...], preferred_element_type=jnp.float32)


# ---------------- wrapper ----------------

_RESIDENT_W_BYTES = 2 * 1024 * 1024   # hold W fully in VMEM if <= 2 MiB
_RESIDENT_X_BYTES = 2 * 1024 * 1024   # per-block x budget on the resident path


@functools.partial(jax.jit, static_argnames=("cast_inputs_to_bf16", "interpret"))
def linear_regression_forward(x, weights, bias_term=None, *,
                              cast_inputs_to_bf16=False, interpret=False):
    """Pallas equivalent of LinearRegression.forward.

    x:         (B, in_features) float32
    weights:   (out_features, in_features) float32  (native PyTorch layout)
    bias_term: (out_features,) float32 or None
    returns:   (B, out_features) float32
    """
    B, in_f = x.shape
    out_f, in_f_w = weights.shape
    assert in_f == in_f_w, "weights/in_features mismatch"

    m_pad = _round_up(B, 8)
    n_pad = _round_up(out_f, 128)
    k_pad = _round_up(in_f, 128)

    # One-time, tiny wrapper-side transpose to canonical MXU (K, N) layout.
    w_t = weights.T

    # Minimal, conditional zero-padding (K must stay zero-padded for the
    # contraction; M/N pads are sliced off at the end).
    x_p = x if (m_pad, k_pad) == (B, in_f) else jnp.pad(
        x, ((0, m_pad - B), (0, k_pad - in_f)))
    w_p = w_t if (k_pad, n_pad) == (in_f, out_f) else jnp.pad(
        w_t, ((0, k_pad - in_f), (0, n_pad - out_f)))

    has_bias = bias_term is not None
    if has_bias:
        b_p = bias_term.astype(jnp.float32)
        if n_pad != out_f:
            b_p = jnp.pad(b_p, (0, n_pad - out_f))
        b_p = b_p.reshape(1, n_pad)

    if cast_inputs_to_bf16:
        # bf16 inputs, f32 accumulation (looser numerics, ~2-4x MXU throughput).
        x_p = x_p.astype(jnp.bfloat16)
        w_p = w_p.astype(jnp.bfloat16)

    itemsize = 4  # budget against f32; bf16 only shrinks it
    w_bytes = k_pad * n_pad * itemsize
    use_resident = (w_bytes <= _RESIDENT_W_BYTES) and (k_pad <= 2048)

    if use_resident:
        # Full-K, full-N blocks; one dot per M-tile, no reduction axis.
        tm_cap = max(8, min(512, (_RESIDENT_X_BYTES // (itemsize * k_pad)) // 8 * 8))
        tm = _pick_tm(m_pad, cap=tm_cap)
        grid = (m_pad // tm,)
        in_specs = [
            pl.BlockSpec((tm, k_pad), lambda i: (i, 0)),      # x tile
            pl.BlockSpec((k_pad, n_pad), lambda i: (0, 0)),   # W resident
        ]
        out_specs = pl.BlockSpec((tm, n_pad), lambda i: (i, 0))
        dim_sem = ("parallel",)
        if has_bias:
            in_specs.append(pl.BlockSpec((1, n_pad), lambda i: (0, 0)))
            kernel, args = _resident_bias_kernel, (x_p, w_p, b_p)
        else:
            kernel, args = _resident_kernel, (x_p, w_p)
    else:
        tm = _pick_tm(m_pad, cap=512)
        tn = _largest_aligned_divisor(n_pad, 128, 256)
        tk = _largest_aligned_divisor(k_pad, 128, 512)   # TK | k_pad: no K over-pad
        grid = (m_pad // tm, n_pad // tn, k_pad // tk)
        in_specs = [
            pl.BlockSpec((tm, tk), lambda i, j, k: (i, k)),   # x tile
            pl.BlockSpec((tk, tn), lambda i, j, k: (k, j)),   # W.T tile (K, N)
        ]
        out_specs = pl.BlockSpec((tm, tn), lambda i, j, k: (i, j))
        dim_sem = ("parallel", "parallel", "arbitrary")
        if has_bias:
            in_specs.append(pl.BlockSpec((1, tn), lambda i, j, k: (0, j)))
            kernel, args = _tiled_bias_kernel, (x_p, w_p, b_p)
        else:
            kernel, args = _tiled_kernel, (x_p, w_p)

    out_p = pl.pallas_call(
        kernel,
        out_shape=jax.ShapeDtypeStruct((m_pad, n_pad), jnp.float32),
        grid_spec=pltpu.PrefetchScalarGridSpec(
            num_scalar_prefetch=0,
            grid=grid,
            in_specs=in_specs,
            out_specs=out_specs,
        ),
        compiler_params=pltpu.CompilerParams(dimension_semantics=dim_sem),
        interpret=interpret,
    )(*args)

    if (m_pad, n_pad) != (B, out_f):
        out_p = out_p[:B, :out_f]
    return out_p


if __name__ == "__main__":
    key = jax.random.PRNGKey(0)
    k1, k2, k3, k4, k5, k6 = jax.random.split(key, 6)

    # --- small, module-consistent toy shapes (resident-weight path) ---
    batch, in_features, out_features = 8, 32, 16
    x = jax.random.normal(k1, (batch, in_features), dtype=jnp.float32)
    w = jax.random.normal(k2, (out_features, in_features), dtype=jnp.float32)
    b = jax.random.normal(k3, (out_features,), dtype=jnp.float32)

    out = jax.block_until_ready(linear_regression_forward(x, w, b))
    ref = x @ w.T + b
    assert out.shape == ref.shape
    assert jnp.allclose(out, ref, atol=1e-5, rtol=1e-5), "mismatch (small, bias)"

    # --- no-bias path (statically separate kernel variant) ---
    out_nb = jax.block_until_ready(linear_regression_forward(x, w, None))
    assert jnp.allclose(out_nb, x @ w.T, atol=1e-5, rtol=1e-5), "mismatch (no bias)"

    # --- larger, non-aligned shapes exercising the tiled K-reduction path ---
    B2, IN2, OUT2 = 512, 1024, 640
    x2 = jax.random.normal(k4, (B2, IN2), dtype=jnp.float32)
    w2 = jax.random.normal(k5, (OUT2, IN2), dtype=jnp.float32)
    b2 = jax.random.normal(k6, (OUT2,), dtype=jnp.float32)
    out2 = jax.block_until_ready(linear_regression_forward(x2, w2, b2))
    ref2 = x2 @ w2.T + b2
    assert jnp.allclose(out2, ref2, atol=1e-3, rtol=1e-4), "mismatch (tiled, bias)"

    print("KERNEL_OK")
</pallas_src>

<mosaic_0001>
module attributes {stable_mosaic.version = 11 : i64} {
  func.func @_resident_bias_kernel(%arg0: i32, %arg1: memref<8x128xf32, #tpu.memory_space<vmem>>, %arg2: memref<128x128xf32, #tpu.memory_space<vmem>>, %arg3: memref<1x128xf32, #tpu.memory_space<vmem>>, %arg4: memref<8x128xf32, #tpu.memory_space<vmem>>) attributes {dimension_semantics = [#tpu.dimension_semantics<parallel>], iteration_bounds = array<i64: 1>, scalar_prefetch = 0 : i64, scratch_operands = 0 : i64, tpu.core_type = #tpu.core_type<tc>, window_params = [{transform_indices = @transform_0, window_bounds = array<i64: 8, 128>}, {pipeline_mode = #tpu.pipeline_mode<synchronous>, transform_indices = @transform_1, window_bounds = array<i64: 128, 128>}, {pipeline_mode = #tpu.pipeline_mode<synchronous>, transform_indices = @transform_2, window_bounds = array<i64: 1, 128>}, {transform_indices = @transform_3, window_bounds = array<i64: 8, 128>}]} {
    %c0 = arith.constant 0 : index
    %c0_0 = arith.constant 0 : index
    %0 = vector.load %arg1[%c0, %c0_0] : memref<8x128xf32, #tpu.memory_space<vmem>>, vector<8x128xf32>
    %c0_1 = arith.constant 0 : index
    %c0_2 = arith.constant 0 : index
    %1 = vector.load %arg2[%c0_1, %c0_2] : memref<128x128xf32, #tpu.memory_space<vmem>>, vector<128x128xf32>
    %cst = arith.constant dense<0.000000e+00> : vector<8x128xf32>
    %2 = tpu.matmul %0, %1, %cst {dimension_numbers = #tpu.dot_dimension_numbers<[1], [0], [0], [1], [0, 0, 1, 1], [], []>} : vector<8x128xf32>, vector<128x128xf32>, vector<8x128xf32> -> vector<8x128xf32>
    %c0_3 = arith.constant 0 : index
    %c0_4 = arith.constant 0 : index
    %3 = vector.load %arg3[%c0_3, %c0_4] : memref<1x128xf32, #tpu.memory_space<vmem>>, vector<1x128xf32>
    %4 = vector.broadcast %3 : vector<1x128xf32> to vector<8x128xf32>
    %5 = arith.addf %2, %4 : vector<8x128xf32>
    %c0_5 = arith.constant 0 : index
    %c0_6 = arith.constant 0 : index
    %6 = vector.load %arg4[%c0_5, %c0_6] : memref<8x128xf32, #tpu.memory_space<vmem>>, vector<8x128xf32>
    tpu.vector_store %arg4[%c0_5, %c0_6], %5 {strides = array<i32>} : memref<8x128xf32, #tpu.memory_space<vmem>>, vector<8x128xf32>,
    return
  }
  func.func @transform_0(%arg0: i32) -> (i32, i32) {
    %c0_i32 = arith.constant 0 : i32
    %c0_i32_0 = arith.constant 0 : i32
    return %arg0, %c0_i32 : i32, i32
  }
  func.func @transform_1(%arg0: i32) -> (i32, i32) {
    %c0_i32 = arith.constant 0 : i32
    %c0_i32_0 = arith.constant 0 : i32
    %c0_i32_1 = arith.constant 0 : i32
    return %c0_i32, %c0_i32_0 : i32, i32
  }
  func.func @transform_2(%arg0: i32) -> (i32, i32) {
    %c0_i32 = arith.constant 0 : i32
    %c0_i32_0 = arith.constant 0 : i32
    %c0_i32_1 = arith.constant 0 : i32
    return %c0_i32, %c0_i32_0 : i32, i32
  }
  func.func @transform_3(%arg0: i32) -> (i32, i32) {
    %c0_i32 = arith.constant 0 : i32
    %c0_i32_0 = arith.constant 0 : i32
    return %arg0, %c0_i32 : i32, i32
  }
}

</mosaic_0001>

<bundles_post_ra>
// kernel: linear_regression_forward.1
= control target key start
LH: loop header
LB: loop body
LE: loop exit
PB: predicated region body
PF: predicated region fallthrough
CT: control target
= control target key end

     0   :  { %s179_s0 = inlined_call_operand.vmem [shape: f32[8,128], index: 0, kind: input, shape index: {}]   ;;  %s180_s1 = inlined_call_operand.vmem [shape: f32[128,128], index: 1, kind: input, shape index: {}]   ;;  %s181_s2 = inlined_call_operand.vmem [shape: f32[1,128], index: 2, kind: input, shape index: {}]   ;;  %s182_s3 = inlined_call_operand.hbm [shape: f32[8,128], index: 3, kind: output, shape index: {}]  }
   0x1   :  { %v31_v0 = vld [vmem:[%s180_s1 + $0x78] sm:$0xff]  ;;  %v30_v1 = vld [vmem:[%s180_s1 + $0x70] sm:$0xff]  ;;  %v29_v2 = vld [vmem:[%s180_s1 + $0x68] sm:$0xff] }
   0x2   :  { %36 = vmatpush.msra.mxu0 %v31_v0  ;;  %v28_v3 = vld [vmem:[%s180_s1 + $0x60] sm:$0xff]  ;;  %v27_v4 = vld [vmem:[%s180_s1 + $0x58] sm:$0xff] }
   0x4   :  { %37 = vmatpush.msra.mxu0 %v30_v1 }
   0x6   :  { %38 = vmatpush.msra.mxu0 %v29_v2 }
   0x7   :  { %8 = vsyncpa [#allocation3], 0  ;;  %v26_v5 = vld [vmem:[%s180_s1 + $0x50] sm:$0xff]  ;;  %v25_v6 = vld [vmem:[%s180_s1 + $0x48] sm:$0xff]  ;;  %s101_s21 = smov [#allocation2]   ;;  %s64_s25 = sshll.u32 %s182_s3, 4  ;;  %s65_s25 = int_to_ptr.hbm [resolvable:$true] %s64_s25 }
   0x8   :  { %39 = vmatpush.msra.mxu0 %v28_v3  ;;  %v24_v7 = vld [vmem:[%s180_s1 + $0x40] sm:$0xff]  ;;  %v23_v8 = vld [vmem:[%s180_s1 + $0x38] sm:$0xff]  ;;  %v22_v9 = vld [vmem:[%s180_s1 + $0x30] sm:$0xff]  ;;  %s62_s22 = sshll.u32 %s101_s21, 4  ;;  %s63_s22 = int_to_ptr.vmem [resolvable:$true] %s62_s22 }
   0x9   :  { %v21_v10 = vld [vmem:[%s180_s1 + $0x28] sm:$0xff]  ;;  %v20_v11 = vld [vmem:[%s180_s1 + $0x20] sm:$0xff]  ;;  %v19_v12 = vld [vmem:[%s180_s1 + $0x18] sm:$0xff] }
   0xa   :  { %40 = vmatpush.msra.mxu0 %v27_v4  ;;  %v18_v13 = vld [vmem:[%s180_s1 + $0x10] sm:$0xff]  ;;  %v17_v14 = vld [vmem:[%s180_s1 + $0x8] sm:$0xff]  ;;  %v16_v15 = vld [vmem:[%s180_s1] sm:$0xff] }
   0xb   :  { %v15_v16 = vld [vmem:[%s179_s0] sm:$0xff] }
   0xc   :  { %41 = vmatpush.msra.mxu0 %v26_v5  ;;  %v74_v17 = vld [vmem:[%s181_s2] ss:$0 sm:$0xff] }
   0xe   :  { %42 = vmatpush.msra.mxu0 %v25_v6 }
  0x10   :  { %43 = vmatpush.msra.mxu0 %v24_v7 }
  0x12   :  { %44 = vmatpush.msra.mxu0 %v23_v8 }
  0x14   :  { %45 = vmatpush.msra.mxu0 %v22_v9 }
  0x16   :  { %46 = vmatpush.msra.mxu0 %v21_v10 }
  0x18   :  { %47 = vmatpush.msra.mxu0 %v20_v11 }
  0x1a   :  { %48 = vmatpush.msra.mxu0 %v19_v12 }
  0x1c   :  { %49 = vmatpush.msra.mxu0 %v18_v13 }
  0x1e   :  { %50 = vmatpush.msra.mxu0 %v17_v14 }
  0x20   :  { %51 = vmatpush.msra.mxu0 %v16_v15 }
  0x21   :  { %52 = vmatmul.f32.vlgmr.msra.gmra.mxu0 %v15_v16 }
  0x9e   :  { %v53_v18 = vpop.f32.mrf.mxu0 }
  0x9f   :  { %v54_v19 = vadd.f32 %v74_v17, %v53_v18 }
  0xa1   :  { %56 = vst [vmem:[#allocation2] sm:$0xff] %v54_v19 }
  0xa2   :  { %67 = dma.vmem_to_hbm [thread:$0]  %s63_s22, 128, %s65_s25, [#allocation3]  }
  0xa3   :  { %99 = dma.done.wait [#allocation3], 128  }
  0xa4   :  { %100 = vsyncadd [#allocation3], 4294967168 }
  0xa5   :  { %72 = vsyncpa [#allocation3], 1 }

</bundles_post_ra>
